<compile_context>
chip_gen: v7x
topology: tpu7x:2x2x1
jax: 0.10.0
libtpu: 0.0.40
codegen_flags: <defaults>
</compile_context>

<pallas_src>
import jax
import jax.numpy as jnp
from jax.experimental import pallas as pl
from jax.experimental.pallas import tpu as pltpu


def _round_up(x, m):
    return ((x + m - 1) // m) * m


def affinity_kernel(s_ref, mask_ref, w_ref, b_ref, o_ref, acc_ref):
    # s_ref:    [TB, TS, C]    activation tile (native dtype)
    # mask_ref: [TB, 1,  TS]   mask tile, sequence on the lane axis (native dtype)
    # w_ref:    [C,  NBP]      linear weight, output dim padded to 128 lanes
    # b_ref:    [1,  NBP]      linear bias, padded
    # o_ref:    [TB, NBP]      output tile (same block index across the S axis)
    # acc_ref:  [TB, C] f32    masked-sum accumulator (VMEM scratch)
    s_idx = pl.program_id(1)

    @pl.when(s_idx == 0)
    def _():
        acc_ref[...] = jnp.zeros_like(acc_ref)

    # Masked partial sum over the sequence axis as a batched (1,TS)@(TS,C)
    # matmul on the MXU, accumulating in f32.  einsum 'b1t,btc->b1c'.
    partial = jax.lax.dot_general(
        mask_ref[...], s_ref[...],
        dimension_numbers=(((2,), (1,)), ((0,), (0,))),
        preferred_element_type=jnp.float32)          # [TB, 1, C]
    acc_ref[...] += partial[:, 0, :]                  # [TB, C]

    @pl.when(s_idx == pl.num_programs(1) - 1)
    def _():
        out = jnp.dot(acc_ref[...], w_ref[...],
                      preferred_element_type=jnp.float32)
        o_ref[...] = (out + b_ref[...]).astype(o_ref.dtype)


def affinity_cls_token_predictor(s, affinity_mask, weight, bias):
    """s: [B, S, C], affinity_mask: [B, S], weight: [C, NB] (PyTorch
    linear.weight transposed), bias: [NB]  ->  [B, NB]"""
    B, S, C = s.shape
    NB = weight.shape[1]
    out_dtype = jnp.result_type(s.dtype, weight.dtype)

    s_elem = jnp.dtype(s.dtype).itemsize
    w_elem = jnp.dtype(weight.dtype).itemsize
    o_elem = jnp.dtype(out_dtype).itemsize

    # Lane-dense output: pad num_bins to a multiple of 128.
    NBP = _round_up(max(NB, 128), 128)
    w_pad = jnp.zeros((C, NBP), weight.dtype).at[:, :NB].set(weight)
    b_pad = jnp.zeros((1, NBP), weight.dtype).at[0, :NB].set(
        bias.astype(weight.dtype))

    # Mask as [B, 1, S] in the activation dtype (values are 0/1, exact in bf16)
    # so the in-kernel contraction is a native-dtype MXU matmul and the mask
    # block keeps the sequence axis on the 128-lane dimension (lane-dense).
    mask3 = affinity_mask.astype(s.dtype).reshape(B, 1, S)

    # ---- Generation-aware VMEM budgets -------------------------------------
    try:
        vmem_cap = int(getattr(pltpu.get_tpu_info(), "vmem_capacity_bytes",
                               64 * 1024 * 1024))
    except Exception:
        vmem_cap = 64 * 1024 * 1024  # conservative (v7x-sized) fallback
    if vmem_cap >= 128 * 1024 * 1024:          # v5e / v6e: 128 MiB physical
        s_budget = 24 * 1024 * 1024            # double-buffered s-tile budget
        vmem_cap_limit = 96 * 1024 * 1024
    else:                                       # v7x: 64 MiB physical
        s_budget = 12 * 1024 * 1024
        vmem_cap_limit = 44 * 1024 * 1024

    # ---- Batch tile: multiple of 8 (or full B), keep >=2 tiles for megacore.
    if B % 8 != 0 or B <= 8:
        TB = B
    else:
        TB = 8
        for cand in (64, 32, 16, 8):
            if B % cand == 0 and B // cand >= 2:
                TB = cand
                break

    # ---- Sequence tile: prefer TS = S (single pass); otherwise a multiple of
    # 128 (lane-dense mask block) with S zero-padded up to a multiple of TS.
    C_vmem = _round_up(C, 128)                  # lane padding of the s block
    per_row = 2 * TB * C_vmem * s_elem          # double-buffered bytes per seq row
    if per_row * _round_up(S, 16) <= s_budget:
        TS = S
        S_pad = S
    else:
        TS = max(128, (s_budget // (per_row * 128)) * 128)
        S_pad = _round_up(S, TS)

    if S_pad != S:
        pad = S_pad - S
        s_in = jnp.pad(s, ((0, 0), (0, pad), (0, 0)))
        mask_in = jnp.pad(mask3, ((0, 0), (0, 0), (0, pad)))
    else:
        s_in, mask_in = s, mask3

    grid = (B // TB, S_pad // TS)

    # ---- Honest VMEM accounting (includes sublane/lane padding). -----------
    TBr = _round_up(TB, 8)
    vmem_need = (
        2 * TB * _round_up(TS, 16) * C_vmem * s_elem        # s tile (x2 buffers)
        + 2 * TB * 8 * _round_up(TS, 128) * s_elem          # mask tile (x2 buffers)
        + 2 * _round_up(C, 8) * NBP * w_elem                # weight (constant block)
        + 2 * 8 * NBP * w_elem                              # bias
        + 2 * TBr * NBP * o_elem                            # output tile
        + TBr * C_vmem * 4                                  # f32 accumulator scratch
    )
    vmem_limit = int(min(vmem_cap_limit,
                         max(vmem_need + vmem_need // 2, 4 * 1024 * 1024)))

    cost = pl.CostEstimate(
        flops=2 * B * S * C + 2 * B * C * NBP,
        transcendentals=0,
        bytes_accessed=(s_elem * B * S * C + s_elem * B * S
                        + w_elem * C * NBP + w_elem * NBP
                        + o_elem * B * NBP),
    )

    out_padded = pl.pallas_call(
        affinity_kernel,
        out_shape=jax.ShapeDtypeStruct((B, NBP), out_dtype),
        grid_spec=pltpu.PrefetchScalarGridSpec(
            num_scalar_prefetch=0,
            grid=grid,
            in_specs=[
                pl.BlockSpec((TB, TS, C), lambda b, si: (b, si, 0)),
                pl.BlockSpec((TB, 1, TS), lambda b, si: (b, 0, si)),
                pl.BlockSpec((C, NBP), lambda b, si: (0, 0)),
                pl.BlockSpec((1, NBP), lambda b, si: (0, 0)),
            ],
            out_specs=pl.BlockSpec((TB, NBP), lambda b, si: (b, 0)),
            scratch_shapes=[pltpu.VMEM((TB, C), jnp.float32)],
        ),
        compiler_params=pltpu.CompilerParams(
            dimension_semantics=("parallel", "arbitrary"),
            vmem_limit_bytes=vmem_limit,
        ),
        cost_estimate=cost,
    )(s_in, mask_in, w_pad, b_pad)

    return out_padded[:, :NB]


if __name__ == "__main__":
    # Small shapes consistent with the module: batch=2, seq=8, c_s=32, num_bins=16.
    B, S, C_S, NUM_BINS = 2, 8, 32, 16

    key = jax.random.PRNGKey(0)
    k_s, k_m, k_w, k_b = jax.random.split(key, 4)

    s = jax.random.normal(k_s, (B, S, C_S), dtype=jnp.float32)
    affinity_mask = (jax.random.uniform(k_m, (B, S)) > 0.5).astype(jnp.float32)

    # Linear(c_s, num_bins, init='final') zero-initializes; use small random
    # values so the kernel output is non-trivial.
    weight = 0.02 * jax.random.normal(k_w, (C_S, NUM_BINS), dtype=jnp.float32)
    bias = 0.01 * jax.random.normal(k_b, (NUM_BINS,), dtype=jnp.float32)

    out = affinity_cls_token_predictor(s, affinity_mask, weight, bias)
    out = jax.block_until_ready(out)

    # Reference check in plain JAX.
    ref_tokens = jnp.sum(s * affinity_mask[:, :, None], axis=1)
    ref = ref_tokens @ weight + bias
    assert out.shape == (B, NUM_BINS)
    assert jnp.allclose(out, ref, atol=1e-5, rtol=1e-5)

    print("KERNEL_OK")
</pallas_src>

<mosaic_0001>
module attributes {stable_mosaic.version = 11 : i64} {
  func.func @affinity_kernel(%arg0: i32, %arg1: i32, %arg2: memref<2x8x32xf32, #tpu.memory_space<vmem>>, %arg3: memref<2x1x8xf32, #tpu.memory_space<vmem>>, %arg4: memref<32x128xf32, #tpu.memory_space<vmem>>, %arg5: memref<1x128xf32, #tpu.memory_space<vmem>>, %arg6: memref<2x128xf32, #tpu.memory_space<vmem>>, %arg7: memref<2x32xf32, #tpu.memory_space<vmem>>) attributes {dimension_semantics = [#tpu.dimension_semantics<parallel>, #tpu.dimension_semantics<arbitrary>], iteration_bounds = array<i64: 1, 1>, scalar_prefetch = 0 : i64, scratch_operands = 1 : i64, tpu.core_type = #tpu.core_type<tc>, window_params = [{transform_indices = @transform_0, window_bounds = array<i64: 2, 8, 32>}, {transform_indices = @transform_1, window_bounds = array<i64: 2, 1, 8>}, {pipeline_mode = #tpu.pipeline_mode<synchronous>, transform_indices = @transform_2, window_bounds = array<i64: 32, 128>}, {pipeline_mode = #tpu.pipeline_mode<synchronous>, transform_indices = @transform_3, window_bounds = array<i64: 1, 128>}, {transform_indices = @transform_4, window_bounds = array<i64: 2, 128>}]} {
    %c0_i32 = arith.constant 0 : i32
    %0 = arith.cmpi eq, %arg1, %c0_i32 : i32
    %1 = arith.extui %0 : i1 to i32
    %c0_i32_0 = arith.constant 0 : i32
    %2 = arith.cmpi ne, %1, %c0_i32_0 : i32
    scf.if %2 {
      %cst_12 = arith.constant 0.000000e+00 : f32
      %13 = vector.broadcast %cst_12 : f32 to vector<2x32xf32>
      %c0_13 = arith.constant 0 : index
      %c0_14 = arith.constant 0 : index
      %14 = vector.load %arg7[%c0_13, %c0_14] : memref<2x32xf32, #tpu.memory_space<vmem>>, vector<2x32xf32>
      tpu.vector_store %arg7[%c0_13, %c0_14], %13 {strides = array<i32>} : memref<2x32xf32, #tpu.memory_space<vmem>>, vector<2x32xf32>,
    } else {
    }
    %c0 = arith.constant 0 : index
    %c0_1 = arith.constant 0 : index
    %c0_2 = arith.constant 0 : index
    %3 = vector.load %arg3[%c0, %c0_1, %c0_2] : memref<2x1x8xf32, #tpu.memory_space<vmem>>, vector<2x1x8xf32>
    %c0_3 = arith.constant 0 : index
    %c0_4 = arith.constant 0 : index
    %c0_5 = arith.constant 0 : index
    %4 = vector.load %arg2[%c0_3, %c0_4, %c0_5] : memref<2x8x32xf32, #tpu.memory_space<vmem>>, vector<2x8x32xf32>
    %cst = arith.constant dense<0.000000e+00> : vector<2x1x32xf32>
    %5 = tpu.matmul %3, %4, %cst {dimension_numbers = #tpu.dot_dimension_numbers<[2], [1], [1], [2], [0, 0, 0, 1, 1, 2], [0], [0]>} : vector<2x1x8xf32>, vector<2x8x32xf32>, vector<2x1x32xf32> -> vector<2x1x32xf32>
    %c0_6 = arith.constant 0 : index
    %c0_7 = arith.constant 0 : index
    %6 = vector.load %arg7[%c0_6, %c0_7] : memref<2x32xf32, #tpu.memory_space<vmem>>, vector<2x32xf32>
    %7 = vector.shape_cast %5 : vector<2x1x32xf32> to vector<2x32xf32>
    %8 = arith.addf %6, %7 : vector<2x32xf32>
    %c0_8 = arith.constant 0 : index
    %c0_9 = arith.constant 0 : index
    %9 = vector.load %arg7[%c0_8, %c0_9] : memref<2x32xf32, #tpu.memory_space<vmem>>, vector<2x32xf32>
    tpu.vector_store %arg7[%c0_8, %c0_9], %8 {strides = array<i32>} : memref<2x32xf32, #tpu.memory_space<vmem>>, vector<2x32xf32>,
    %c0_i32_10 = arith.constant 0 : i32
    %10 = arith.cmpi eq, %arg1, %c0_i32_10 : i32
    %11 = arith.extui %10 : i1 to i32
    %c0_i32_11 = arith.constant 0 : i32
    %12 = arith.cmpi ne, %11, %c0_i32_11 : i32
    scf.if %12 {
      %c0_12 = arith.constant 0 : index
      %c0_13 = arith.constant 0 : index
      %13 = vector.load %arg7[%c0_12, %c0_13] : memref<2x32xf32, #tpu.memory_space<vmem>>, vector<2x32xf32>
      %c0_14 = arith.constant 0 : index
      %c0_15 = arith.constant 0 : index
      %14 = vector.load %arg4[%c0_14, %c0_15] : memref<32x128xf32, #tpu.memory_space<vmem>>, vector<32x128xf32>
      %cst_16 = arith.constant dense<0.000000e+00> : vector<2x128xf32>
      %15 = tpu.matmul %13, %14, %cst_16 {dimension_numbers = #tpu.dot_dimension_numbers<[1], [0], [0], [1], [0, 0, 1, 1], [], []>} : vector<2x32xf32>, vector<32x128xf32>, vector<2x128xf32> -> vector<2x128xf32>
      %c0_17 = arith.constant 0 : index
      %c0_18 = arith.constant 0 : index
      %16 = vector.load %arg5[%c0_17, %c0_18] : memref<1x128xf32, #tpu.memory_space<vmem>>, vector<1x128xf32>
      %17 = vector.broadcast %16 : vector<1x128xf32> to vector<2x128xf32>
      %18 = arith.addf %15, %17 : vector<2x128xf32>
      %c0_19 = arith.constant 0 : index
      %c0_20 = arith.constant 0 : index
      %19 = vector.load %arg6[%c0_19, %c0_20] : memref<2x128xf32, #tpu.memory_space<vmem>>, vector<2x128xf32>
      tpu.vector_store %arg6[%c0_19, %c0_20], %18 {strides = array<i32>} : memref<2x128xf32, #tpu.memory_space<vmem>>, vector<2x128xf32>,
    } else {
    }
    return
  }
  func.func @transform_0(%arg0: i32, %arg1: i32) -> (i32, i32, i32) {
    %c0_i32 = arith.constant 0 : i32
    %c0_i32_0 = arith.constant 0 : i32
    return %arg0, %arg1, %c0_i32 : i32, i32, i32
  }
  func.func @transform_1(%arg0: i32, %arg1: i32) -> (i32, i32, i32) {
    %c0_i32 = arith.constant 0 : i32
    %c0_i32_0 = arith.constant 0 : i32
    return %arg0, %c0_i32, %arg1 : i32, i32, i32
  }
  func.func @transform_2(%arg0: i32, %arg1: i32) -> (i32, i32) {
    %c0_i32 = arith.constant 0 : i32
    %c0_i32_0 = arith.constant 0 : i32
    %c0_i32_1 = arith.constant 0 : i32
    return %c0_i32, %c0_i32_0 : i32, i32
  }
  func.func @transform_3(%arg0: i32, %arg1: i32) -> (i32, i32) {
    %c0_i32 = arith.constant 0 : i32
    %c0_i32_0 = arith.constant 0 : i32
    %c0_i32_1 = arith.constant 0 : i32
    return %c0_i32, %c0_i32_0 : i32, i32
  }
  func.func @transform_4(%arg0: i32, %arg1: i32) -> (i32, i32) {
    %c0_i32 = arith.constant 0 : i32
    %c0_i32_0 = arith.constant 0 : i32
    return %arg0, %c0_i32 : i32, i32
  }
}

</mosaic_0001>

<bundles_post_ra>
// kernel: tpu_custom_call.1
= control target key start
LH: loop header
LB: loop body
LE: loop exit
PB: predicated region body
PF: predicated region fallthrough
CT: control target
= control target key end

     0   :  { %9 = vsyncpa [#allocation4], 0  ;;  %s519_s0 = inlined_call_operand.hbm [shape: f32[2,8,32], index: 0, kind: input, shape index: {}]   ;;  %s520_s1 = inlined_call_operand.vmem [shape: f32[2,1,8], index: 1, kind: input, shape index: {}]   ;;  %s521_s2 = inlined_call_operand.hbm [shape: f32[32,128], index: 2, kind: input, shape index: {}]   ;;  %s522_s3 = inlined_call_operand.vmem [shape: f32[1,128], index: 3, kind: input, shape index: {}]   ;;  %s523_s4 = inlined_call_operand.hbm [shape: f32[2,128], index: 4, kind: output, shape index: {}]  }
   0x1   :  { %10 = vsyncpa [#allocation7], 0 }
   0x2   :  { %11 = vsyncpa [#allocation5], 0  ;;  %s439_s15 = smov [#allocation3]   ;;  %s367_s19 = scalar_lea.hbm %s519_s0, 256 }
   0x3   :  { %s17_s16 = sshll.u32 %s439_s15, 4  ;;  %p368_p0 = scmp.ne.s32.totalorder %s519_s0, %s367_s19  ;;  %s18_s16 = int_to_ptr.vmem [resolvable:$true] %s17_s16 }
   0x4   :  { %p371_p1 = scmp.lt.u32.totalorder %s367_s19, %s519_s0 }
   0x6   :  { %p373_p2 = pnand %p371_p1, %p368_p0 }
   0x8   :  { %376 = shalt.err (!%p373_p2)
}
   0x9   :  { %s377_s24 = scalar_lea.vmem %s18_s16, 256  ;;  %p382_p4 = scmp.lt.s32.totalorder %s18_s16, %s18_s16 }
   0xa   :  { %p378_p3 = scmp.ne.s32.totalorder %s18_s16, %s377_s24  ;;  %p383_p5 = scmp.lt.s32.totalorder %s377_s24, %s377_s24 }
   0xc   :  { %p384_p6 = por %p383_p5, %p382_p4 }
   0xe   :  { %p385_p7 = pnand %p384_p6, %p378_p3 }
  0x10   :  { %388 = shalt.err (!%p385_p7)
}
  0x11   :  { %s440_s25 = smov 128   ;;  %s441_s26 = smov 8  }
  0x12   :  { %23 = dma.hbm_to_vmem [thread:$0]  %s519_s0, 256, %s18_s16, [#allocation4], %s440_s25, %s440_s25, %s441_s26  }
  0x13   :  { %s442_s29 = smov [#allocation6]   ;;  %s389_s7 = scalar_lea.hbm %s521_s2, 512 }
  0x14   :  { %s31_s30 = sshll.u32 %s442_s29, 4  ;;  %p390_p8 = scmp.ne.s32.totalorder %s521_s2, %s389_s7  ;;  %s32_s30 = int_to_ptr.vmem [resolvable:$true] %s31_s30 }
  0x15   :  { %p393_p9 = scmp.lt.u32.totalorder %s389_s7, %s521_s2 }
  0x17   :  { %p395_p10 = pnand %p393_p9, %p390_p8 }
  0x19   :  { %398 = shalt.err (!%p395_p10)
}
  0x1a   :  { %s399_s12 = scalar_lea.vmem %s32_s30, 512  ;;  %p404_p12 = scmp.lt.s32.totalorder %s32_s30, %s32_s30 }
  0x1b   :  { %p400_p11 = scmp.ne.s32.totalorder %s32_s30, %s399_s12  ;;  %p405_p13 = scmp.lt.s32.totalorder %s399_s12, %s399_s12 }
  0x1d   :  { %p406_p0 = por %p405_p13, %p404_p12 }
  0x1f   :  { %p407_p1 = pnand %p406_p0, %p400_p11 }
  0x21   :  { %410 = shalt.err (!%p407_p1)
}
  0x22   :  { %37 = dma.hbm_to_vmem [thread:$0]  %s521_s2, 512, %s32_s30, [#allocation7], %s440_s25, %s440_s25, %s441_s26  }
  0x23   :  { %433 = dma.done.wait [#allocation4], 256  }
  0x24   :  { %434 = vsyncadd [#allocation4], 4294967040 }
  0x25   :  { %435 = dma.done.wait [#allocation7], 512  }
  0x26   :  { %436 = vsyncadd [#allocation7], 4294966784  ;;  %vm50_vm0 = vcmask 254976   ;;  %v443_v0 = vmov 0.0   ;;  %vm444_vm1 = vmmov 0   ;;  %vm56_vm2 = vcmask 64512  }
  0x27   :  { %51 = vst.msk [vmem:[#allocation2] sm:$0x3] %vm50_vm0, %v443_v0  ;;  %332 = vmatprep.subr.mxu1 %v443_v0  ;;  %334 = vmatprep.mubr.msk.f32.mxu1 %vm444_vm1, %v443_v0  ;;  %v54_v1 = vld [vmem:[#allocation3] sm:$0xff]  ;;  %v52_v2 = vld [vmem:[%s520_s1] sm:$0x1]  ;;  %v55_v3 = vld [vmem:[#allocation3 + $0x8] sm:$0xff] }
  0x28   :  { %350 = vmatprep.mubr.msk.f32.mxu0 %vm444_vm1, %v443_v0  ;;  %333 = vmatpush3.msra.mxu1 %v54_v1  ;;  %v53_v4 = vld [vmem:[%s520_s1 + $0x1] sm:$0x1]  ;;  %v217_v5 = vld [vmem:[#allocation6] sm:$0xff]  ;;  %v445_v8 = vmov 0.0|0.0   ;;  %v219_v9 = vld [vmem:[#allocation6 + $0x10] sm:$0xff]  ;;  %vm207_vm3 = vcmask 1041409  }
  0x29   :  { %335 = vmatmul.mubr.msk.f32.vlgmr.msra.gmra.mrb[0].mxu1 %vm56_vm2, %v52_v2  ;;  %337 = vmatprep.subr.mxu1 %v443_v0  ;;  %v218_v6 = vld [vmem:[#allocation6 + $0x8] sm:$0xff]  ;;  %v220_v10 = vld [vmem:[#allocation6 + $0x18] sm:$0xff]  ;;  %vm228_vm4 = vcmask 261120   ;;  %s446_s18 = smov [#allocation8]  }
  0x2a   :  { %338 = vmatpush3.msra.mxu1 %v55_v3  ;;  %339 = vmatprep.mubr.msk.f32.mxu1 %vm444_vm1, %v443_v0  ;;  %v354_v7 = vpack.c.bf16 %v218_v6, %v217_v5  ;;  %v357_v11 = vpack.c.bf16 %v220_v10, %v219_v9  ;;  %v321_v21 = vld [vmem:[%s522_s3] ss:$0 sm:$0xff]  ;;  %s309_s19 = sshll.u32 %s446_s18, 4  ;;  %s310_s19 = int_to_ptr.vmem [resolvable:$true] %s309_s19 }
  0x2b   :  { %353 = vmatprep.subr.bf16.mxu0 %v445_v8  ;;  %s411_s20 = scalar_lea.vmem %s310_s19, 32  ;;  %p416_p3 = scmp.lt.s32.totalorder %s310_s19, %s310_s19 }
  0x2c   :  { %355 = vmatpush3.bf16.msra.mxu0 %v354_v7  ;;  %p412_p2 = scmp.ne.s32.totalorder %s310_s19, %s411_s20  ;;  %p417_p4 = scmp.lt.s32.totalorder %s411_s20, %s411_s20 }
  0x2d   :  { %340 = vmatmul.mubr.msk.f32.vlgmr.msra.gmra.mrb[2].mxu1 %vm56_vm2, %v53_v4  ;;  %356 = vmatprep.subr.bf16.mxu0 %v445_v8 }
  0x2e   :  { %v203_v15 = vld [vmem:[#allocation2] sm:$0x3]  ;;  %p418_p5 = por %p417_p4, %p416_p3 }
  0x30   :  { %358 = vmatpush3.bf16.msra.mxu0 %v357_v11  ;;  %p419_p6 = pnand %p418_p5, %p412_p2 }
  0xfc   :  { %v126_v12 = vpop.f32.mrb[0].mxu1 }
  0xfd   :  { %v336_v13 = vpop.f32.mrb[1].mxu1 }
 0x100   :  { %v199_v14 = vpop.f32.mrb[2].mxu1 }
 0x101   :  { %v206_v16 = vrot.slane %v199_v14, 7  ;;  %v341_v17 = vpop.f32.mrb[3].mxu1 }
 0x103   :  { %v208_v18 = vsel %vm207_vm3, %v206_v16, %v126_v12 }
 0x104   :  { %v210_v19 = vadd.f32 %v208_v18, %v203_v15 }
 0x106   :  { %212 = vst.msk [vmem:[#allocation2] sm:$0x3] %vm50_vm0, %v210_v19 }
 0x10d   :  { %v216_v20 = vld [vmem:[#allocation2] sm:$0x3] }
 0x10e   :  { %351 = vmatmul.mubr.msk.f32.vlgmr.msra.gmra.mrb[0].mxu0 %vm228_vm4, %v216_v20 }
 0x1e1   :  { %v298_v22 = vpop.f32.mrb[0].mxu0 }
 0x1e2   :  { %v299_v23 = vadd.f32 %v321_v21, %v298_v22  ;;  %v352_v24 = vpop.f32.mrb[1].mxu0 }
 0x1e4   :  { %302 = vst [vmem:[#allocation8] sm:$0x3] %v299_v23 }
 0x1e5   :  { %422 = shalt.err (!%p419_p6)
}
 0x1e6   :  { %s423_s23 = scalar_lea.hbm %s523_s4, 32 }
 0x1e7   :  { %p424_p7 = scmp.ne.s32.totalorder %s523_s4, %s423_s23  ;;  %p427_p8 = scmp.lt.u32.totalorder %s423_s23, %s523_s4 }
 0x1e9   :  { %p429_p9 = pnand %p427_p8, %p424_p7 }
 0x1eb   :  { %432 = shalt.err (!%p429_p9)
}
 0x1ec   :  { %312 = dma.vmem_to_hbm [thread:$0]  %s310_s19, 32, %s523_s4, [#allocation5]  }
 0x1ed   :  { %437 = dma.done.wait [#allocation5], 32  }
 0x1ee   :  { %438 = vsyncadd [#allocation5], 4294967264 }
 0x1ef   :  { %316 = vsyncpa [#allocation4], 1 }
 0x1f0   :  { %317 = vsyncpa [#allocation7], 1 }
 0x1f1   :  { %318 = vsyncpa [#allocation5], 1 }

</bundles_post_ra>
